<compile_context>
chip_gen: v5e
topology: v5e:2x2
jax: 0.10.0
libtpu: 0.0.40
codegen_flags: <defaults>
</compile_context>

<pallas_src>
import jax
import jax.numpy as jnp
from jax import lax
from jax.experimental import pallas as pl
from jax.experimental.pallas import tpu as pltpu

BN_EPS = 1e-5


# ----------------------------------------------------------------------------- kernel
def _dan_kernel(x_ref, w1_ref, b1_ref, w2_ref, b2_ref, w3_ref, b3_ref, o_ref):
    x = x_ref[...].astype(jnp.float32)                       # (B, NI)

    # --- bn1 (training mode: batch stats, biased variance), shared by all neurons ---
    m1 = jnp.mean(x, axis=0, keepdims=True)
    v1 = jnp.mean((x - m1) * (x - m1), axis=0, keepdims=True)
    xh = (x - m1) * lax.rsqrt(v1 + BN_EPS)                   # (B, NI)
    # (bn1 gamma/beta are folded into w1/b1 at pack time)

    # --- lin1 (all neurons fused along the output axis) + tanh ---
    h1 = jnp.tanh(
        jnp.dot(xh, w1_ref[...], preferred_element_type=jnp.float32) + b1_ref[...]
    )                                                        # (B, N*NF)

    # --- bn2: per-column batch norm over the concatenated activations.
    # Exactly equivalent to per-neuron BatchNorm1d(NF) since columns are disjoint. ---
    m2 = jnp.mean(h1, axis=0, keepdims=True)
    v2 = jnp.mean((h1 - m2) * (h1 - m2), axis=0, keepdims=True)
    h1h = (h1 - m2) * lax.rsqrt(v2 + BN_EPS)
    # (bn2 gamma/beta are folded into w2/b2 at pack time)

    # --- lin2 (block-diagonal packed weight) + tanh ---
    h2 = jnp.tanh(
        jnp.dot(h1h, w2_ref[...], preferred_element_type=jnp.float32) + b2_ref[...]
    )                                                        # (B, N*NF)

    # --- lin3 (block-diagonal packed weight) -> lane-dense torch.cat(dim=1) layout ---
    out = jnp.dot(h2, w3_ref[...], preferred_element_type=jnp.float32) + b3_ref[...]
    o_ref[...] = out.astype(o_ref.dtype)                     # (B, N*NOUT)


# ----------------------------------------------------------------------------- wrapper
def dan_layer_forward(x, packed):
    """x: (B, NI).  packed: fused/packed params from pack_dan_params.

    Returns (B, neurons * NOUT) == torch.cat([neuron_i(x) for i], dim=1).
    """
    B, NI = x.shape
    n_out_cols = packed["w3"].shape[-1]                      # N * NOUT

    vmem_spec = pl.BlockSpec(memory_space=pltpu.MemorySpace.VMEM)

    return pl.pallas_call(
        _dan_kernel,
        out_shape=jax.ShapeDtypeStruct((B, n_out_cols), x.dtype),
        in_specs=[vmem_spec] * 7,        # full arrays resident in VMEM, single step
        out_specs=vmem_spec,
    )(x,
      packed["w1"], packed["b1"],
      packed["w2"], packed["b2"],
      packed["w3"], packed["b3"])


# ----------------------------------------------------------------------------- params
def init_dan_params(key, neurons, ni, nf, nout):
    """Per-neuron parameters in PyTorch layout (Linear weight: (fan_out, fan_in),
    init U(-1/sqrt(fan_in), 1/sqrt(fan_in)); BatchNorm: gamma=1, beta=0)."""
    ks = jax.random.split(key, neurons * 6).reshape(neurons, 6, 2)

    def lin(k_w, k_b, fan_in, fan_out):
        bound = 1.0 / jnp.sqrt(jnp.float32(fan_in))
        w = jax.random.uniform(k_w, (fan_out, fan_in), jnp.float32, -bound, bound)
        b = jax.random.uniform(k_b, (fan_out,), jnp.float32, -bound, bound)
        return w, b

    w1, b1, w2, b2, w3, b3 = [], [], [], [], [], []
    for n in range(neurons):
        w, b = lin(ks[n, 0], ks[n, 1], ni, nf);   w1.append(w); b1.append(b)
        w, b = lin(ks[n, 2], ks[n, 3], nf, nf);   w2.append(w); b2.append(b)
        w, b = lin(ks[n, 4], ks[n, 5], nf, nout); w3.append(w); b3.append(b)

    return {
        "g1": jnp.ones((neurons, ni), jnp.float32),
        "be1": jnp.zeros((neurons, ni), jnp.float32),
        "w1": jnp.stack(w1), "b1": jnp.stack(b1),
        "g2": jnp.ones((neurons, nf), jnp.float32),
        "be2": jnp.zeros((neurons, nf), jnp.float32),
        "w2": jnp.stack(w2), "b2": jnp.stack(b2),
        "w3": jnp.stack(w3), "b3": jnp.stack(b3),
    }


def _block_diag(blocks):
    """blocks: (N, R, C) -> (N*R, N*C) block-diagonal matrix (host-side, once)."""
    n, r, c = blocks.shape
    out = jnp.zeros((n * r, n * c), blocks.dtype)
    for i in range(n):
        out = out.at[i * r:(i + 1) * r, i * c:(i + 1) * c].set(blocks[i])
    return out


def pack_dan_params(p):
    """Fold BN affine params into the following Linear and pack per-neuron weights
    into fused / block-diagonal matrices for the single-step kernel (all in f32)."""
    n, nf, ni = p["w1"].shape
    nout = p["w3"].shape[1]

    # ---- lin1: fold bn1 affine, concatenate along output axis -> (NI, N*NF) ----
    w1t = jnp.transpose(p["w1"], (0, 2, 1))                        # (N, NI, NF)
    w1f = p["g1"][:, :, None] * w1t                                # scale rows by gamma1
    b1f = jnp.einsum("ni,nif->nf", p["be1"], w1t) + p["b1"]        # beta1 @ W1^T + b1
    w1 = jnp.transpose(w1f, (1, 0, 2)).reshape(ni, n * nf)
    b1 = b1f.reshape(1, n * nf)

    # ---- lin2: fold bn2 affine, block-diagonal -> (N*NF, N*NF) ----
    w2t = jnp.transpose(p["w2"], (0, 2, 1))                        # (N, NF, NF)
    w2f = p["g2"][:, :, None] * w2t
    b2f = jnp.einsum("nf,nfg->ng", p["be2"], w2t) + p["b2"]
    w2 = _block_diag(w2f)
    b2 = b2f.reshape(1, n * nf)

    # ---- lin3: block-diagonal -> (N*NF, N*NOUT); output is torch.cat(dim=1) layout ----
    w3t = jnp.transpose(p["w3"], (0, 2, 1))                        # (N, NF, NOUT)
    w3 = _block_diag(w3t)
    b3 = p["b3"].reshape(1, n * nout)

    return {"w1": w1, "b1": b1, "w2": w2, "b2": b2, "w3": w3, "b3": b3}


# ----------------------------------------------------------------------------- reference
def dan_layer_ref(x, p):
    """Pure-JAX reference mirroring the PyTorch per-neuron forward (training mode)."""
    outs = []
    n = p["w1"].shape[0]
    for i in range(n):
        m1 = jnp.mean(x, axis=0, keepdims=True)
        v1 = jnp.mean((x - m1) ** 2, axis=0, keepdims=True)
        xh = (x - m1) / jnp.sqrt(v1 + BN_EPS) * p["g1"][i] + p["be1"][i]
        h1 = jnp.tanh(xh @ p["w1"][i].T + p["b1"][i])
        m2 = jnp.mean(h1, axis=0, keepdims=True)
        v2 = jnp.mean((h1 - m2) ** 2, axis=0, keepdims=True)
        h1h = (h1 - m2) / jnp.sqrt(v2 + BN_EPS) * p["g2"][i] + p["be2"][i]
        h2 = jnp.tanh(h1h @ p["w2"][i].T + p["b2"][i])
        outs.append(h2 @ p["w3"][i].T + p["b3"][i])
    return jnp.concatenate(outs, axis=1)


if __name__ == "__main__":
    # DANLayer(neurons=4, n_ni=8, n_nf=32, n_nout_ni=16, p_neurons=1)
    neurons, n_ni, n_nf, n_nout, p_neurons = 4, 8, 32, 16, 1
    ni = n_ni * p_neurons
    batch = 8

    key = jax.random.PRNGKey(0)
    k_x, k_p = jax.random.split(key)
    x = jax.random.normal(k_x, (batch, ni), jnp.float32)

    raw = init_dan_params(k_p, neurons, ni, n_nf, n_nout)
    packed = pack_dan_params(raw)

    out = dan_layer_forward(x, packed)
    out = jax.block_until_ready(out)

    ref = dan_layer_ref(x, raw)
    assert out.shape == (batch, neurons * n_nout), out.shape
    err = float(jnp.abs(out - ref).max())
    assert jnp.allclose(out, ref, atol=1e-4, rtol=1e-4), err

    print("KERNEL_OK")
</pallas_src>

<mosaic_0001>
module attributes {stable_mosaic.version = 11 : i64} {
  func.func @_dan_kernel(%arg0: memref<8x8xf32, #tpu.memory_space<vmem>>, %arg1: memref<8x128xf32, #tpu.memory_space<vmem>>, %arg2: memref<1x128xf32, #tpu.memory_space<vmem>>, %arg3: memref<128x128xf32, #tpu.memory_space<vmem>>, %arg4: memref<1x128xf32, #tpu.memory_space<vmem>>, %arg5: memref<128x64xf32, #tpu.memory_space<vmem>>, %arg6: memref<1x64xf32, #tpu.memory_space<vmem>>, %arg7: memref<8x64xf32, #tpu.memory_space<vmem>>) attributes {dimension_semantics = [], scalar_prefetch = 0 : i64, scratch_operands = 0 : i64, tpu.core_type = #tpu.core_type<tc>} {
    %c0 = arith.constant 0 : index
    %c0_0 = arith.constant 0 : index
    %0 = vector.load %arg0[%c0, %c0_0] : memref<8x8xf32, #tpu.memory_space<vmem>>, vector<8x8xf32>
    %cst = arith.constant dense<0.000000e+00> : vector<8xf32>
    %1 = vector.multi_reduction <add>, %0, %cst [0] : vector<8x8xf32> to vector<8xf32>
    %2 = vector.shape_cast %1 : vector<8xf32> to vector<1x8xf32>
    %cst_1 = arith.constant 8.000000e+00 : f32
    %3 = vector.broadcast %cst_1 : f32 to vector<1x8xf32>
    %4 = arith.divf %2, %3 : vector<1x8xf32>
    %5 = vector.broadcast %4 : vector<1x8xf32> to vector<8x8xf32>
    %6 = arith.subf %0, %5 : vector<8x8xf32>
    %7 = vector.broadcast %4 : vector<1x8xf32> to vector<8x8xf32>
    %8 = arith.subf %0, %7 : vector<8x8xf32>
    %9 = arith.mulf %6, %8 : vector<8x8xf32>
    %cst_2 = arith.constant dense<0.000000e+00> : vector<8xf32>
    %10 = vector.multi_reduction <add>, %9, %cst_2 [0] : vector<8x8xf32> to vector<8xf32>
    %11 = vector.shape_cast %10 : vector<8xf32> to vector<1x8xf32>
    %cst_3 = arith.constant 8.000000e+00 : f32
    %12 = vector.broadcast %cst_3 : f32 to vector<1x8xf32>
    %13 = arith.divf %11, %12 : vector<1x8xf32>
    %14 = vector.broadcast %4 : vector<1x8xf32> to vector<8x8xf32>
    %15 = arith.subf %0, %14 : vector<8x8xf32>
    %cst_4 = arith.constant 9.99999974E-6 : f32
    %16 = vector.broadcast %cst_4 : f32 to vector<1x8xf32>
    %17 = arith.addf %13, %16 : vector<1x8xf32>
    %18 = math.rsqrt %17 : vector<1x8xf32>
    %19 = vector.broadcast %18 : vector<1x8xf32> to vector<8x8xf32>
    %20 = arith.mulf %15, %19 : vector<8x8xf32>
    %c0_5 = arith.constant 0 : index
    %c0_6 = arith.constant 0 : index
    %21 = vector.load %arg1[%c0_5, %c0_6] : memref<8x128xf32, #tpu.memory_space<vmem>>, vector<8x128xf32>
    %cst_7 = arith.constant dense<0.000000e+00> : vector<8x128xf32>
    %22 = tpu.matmul %20, %21, %cst_7 {dimension_numbers = #tpu.dot_dimension_numbers<[1], [0], [0], [1], [0, 0, 1, 1], [], []>} : vector<8x8xf32>, vector<8x128xf32>, vector<8x128xf32> -> vector<8x128xf32>
    %c0_8 = arith.constant 0 : index
    %c0_9 = arith.constant 0 : index
    %23 = vector.load %arg2[%c0_8, %c0_9] : memref<1x128xf32, #tpu.memory_space<vmem>>, vector<1x128xf32>
    %24 = vector.broadcast %23 : vector<1x128xf32> to vector<8x128xf32>
    %25 = arith.addf %22, %24 : vector<8x128xf32>
    %26 = math.tanh %25 : vector<8x128xf32>
    %cst_10 = arith.constant dense<0.000000e+00> : vector<128xf32>
    %27 = vector.multi_reduction <add>, %26, %cst_10 [0] : vector<8x128xf32> to vector<128xf32>
    %28 = vector.shape_cast %27 : vector<128xf32> to vector<1x128xf32>
    %cst_11 = arith.constant 8.000000e+00 : f32
    %29 = vector.broadcast %cst_11 : f32 to vector<1x128xf32>
    %30 = arith.divf %28, %29 : vector<1x128xf32>
    %31 = vector.broadcast %30 : vector<1x128xf32> to vector<8x128xf32>
    %32 = arith.subf %26, %31 : vector<8x128xf32>
    %33 = vector.broadcast %30 : vector<1x128xf32> to vector<8x128xf32>
    %34 = arith.subf %26, %33 : vector<8x128xf32>
    %35 = arith.mulf %32, %34 : vector<8x128xf32>
    %cst_12 = arith.constant dense<0.000000e+00> : vector<128xf32>
    %36 = vector.multi_reduction <add>, %35, %cst_12 [0] : vector<8x128xf32> to vector<128xf32>
    %37 = vector.shape_cast %36 : vector<128xf32> to vector<1x128xf32>
    %cst_13 = arith.constant 8.000000e+00 : f32
    %38 = vector.broadcast %cst_13 : f32 to vector<1x128xf32>
    %39 = arith.divf %37, %38 : vector<1x128xf32>
    %40 = vector.broadcast %30 : vector<1x128xf32> to vector<8x128xf32>
    %41 = arith.subf %26, %40 : vector<8x128xf32>
    %cst_14 = arith.constant 9.99999974E-6 : f32
    %42 = vector.broadcast %cst_14 : f32 to vector<1x128xf32>
    %43 = arith.addf %39, %42 : vector<1x128xf32>
    %44 = math.rsqrt %43 : vector<1x128xf32>
    %45 = vector.broadcast %44 : vector<1x128xf32> to vector<8x128xf32>
    %46 = arith.mulf %41, %45 : vector<8x128xf32>
    %c0_15 = arith.constant 0 : index
    %c0_16 = arith.constant 0 : index
    %47 = vector.load %arg3[%c0_15, %c0_16] : memref<128x128xf32, #tpu.memory_space<vmem>>, vector<128x128xf32>
    %cst_17 = arith.constant dense<0.000000e+00> : vector<8x128xf32>
    %48 = tpu.matmul %46, %47, %cst_17 {dimension_numbers = #tpu.dot_dimension_numbers<[1], [0], [0], [1], [0, 0, 1, 1], [], []>} : vector<8x128xf32>, vector<128x128xf32>, vector<8x128xf32> -> vector<8x128xf32>
    %c0_18 = arith.constant 0 : index
    %c0_19 = arith.constant 0 : index
    %49 = vector.load %arg4[%c0_18, %c0_19] : memref<1x128xf32, #tpu.memory_space<vmem>>, vector<1x128xf32>
    %50 = vector.broadcast %49 : vector<1x128xf32> to vector<8x128xf32>
    %51 = arith.addf %48, %50 : vector<8x128xf32>
    %52 = math.tanh %51 : vector<8x128xf32>
    %c0_20 = arith.constant 0 : index
    %c0_21 = arith.constant 0 : index
    %53 = vector.load %arg5[%c0_20, %c0_21] : memref<128x64xf32, #tpu.memory_space<vmem>>, vector<128x64xf32>
    %cst_22 = arith.constant dense<0.000000e+00> : vector<8x64xf32>
    %54 = tpu.matmul %52, %53, %cst_22 {dimension_numbers = #tpu.dot_dimension_numbers<[1], [0], [0], [1], [0, 0, 1, 1], [], []>} : vector<8x128xf32>, vector<128x64xf32>, vector<8x64xf32> -> vector<8x64xf32>
    %c0_23 = arith.constant 0 : index
    %c0_24 = arith.constant 0 : index
    %55 = vector.load %arg6[%c0_23, %c0_24] : memref<1x64xf32, #tpu.memory_space<vmem>>, vector<1x64xf32>
    %56 = vector.broadcast %55 : vector<1x64xf32> to vector<8x64xf32>
    %57 = arith.addf %54, %56 : vector<8x64xf32>
    %c0_25 = arith.constant 0 : index
    %c0_26 = arith.constant 0 : index
    %58 = vector.load %arg7[%c0_25, %c0_26] : memref<8x64xf32, #tpu.memory_space<vmem>>, vector<8x64xf32>
    tpu.vector_store %arg7[%c0_25, %c0_26], %57 {strides = array<i32>} : memref<8x64xf32, #tpu.memory_space<vmem>>, vector<8x64xf32>,
    return
  }
}

</mosaic_0001>

<bundles_post_ra>
// kernel: tpu_custom_call.1
= control target key start
LH: loop header
LB: loop body
LE: loop exit
PB: predicated region body
PF: predicated region fallthrough
CT: control target
= control target key end

     0   :  { %vm28_vm0 = vcmask 64512   ;;  %v264_v3 = vmov 8.0   ;;  %s429_s0 = inlined_call_operand.vmem [shape: f32[8,8], index: 0, kind: input, shape index: {}]   ;;  %s430_s1 = inlined_call_operand.vmem [shape: f32[8,128], index: 1, kind: input, shape index: {}]   ;;  %s431_s2 = inlined_call_operand.vmem [shape: f32[1,128], index: 2, kind: input, shape index: {}]   ;;  %s432_s3 = inlined_call_operand.vmem [shape: f32[128,128], index: 3, kind: input, shape index: {}]   ;;  %s433_s4 = inlined_call_operand.vmem [shape: f32[1,128], index: 4, kind: input, shape index: {}]   ;;  %s434_s5 = inlined_call_operand.vmem [shape: f32[128,64], index: 5, kind: input, shape index: {}]   ;;  %s435_s6 = inlined_call_operand.vmem [shape: f32[1,64], index: 6, kind: input, shape index: {}]   ;;  %s436_s7 = inlined_call_operand.hbm [shape: f32[8,64], index: 7, kind: output, shape index: {}]  }
   0x1   :  { %v66_v0 = vld [vmem:[%s430_s1] sm:$0xff]  ;;  %228 = vrcp.f32 %v264_v3 }
   0x2   :  { %v27_v1 = vld [vmem:[%s429_s0] sm:$0xff]  ;;  %89 = vmatpush.msra.mxu0 %v66_v0 }
   0x3   :  { %v29_v2 = vsel %vm28_vm0, %v27_v1, 0.0 }
   0x4   :  { %v30_v4 = vrot.slane %v29_v2, 4 }
   0x5   :  { %12 = vsyncpa [#allocation3], 0  ;;  %v138_v36 = vld [vmem:[%s432_s3 + $0x78] sm:$0xff]  ;;  %v137_v37 = vld [vmem:[%s432_s3 + $0x70] sm:$0xff]  ;;  %s265_s19 = smov [#allocation2]   ;;  %vm204_vm8 = vcmask 523264  }
   0x6   :  { %v31_v5 = vadd.f32 %v30_v4, %v29_v2  ;;  %143 = vmatpush.msra.mxu1 %v138_v36  ;;  %v136_v38 = vld [vmem:[%s432_s3 + $0x68] sm:$0xff]  ;;  %v135_v39 = vld [vmem:[%s432_s3 + $0x60] sm:$0xff]  ;;  %v134_v40 = vld [vmem:[%s432_s3 + $0x58] sm:$0xff]  ;;  %s211_s20 = sshll.u32 %s265_s19, 4  ;;  %s212_s20 = int_to_ptr.vmem [resolvable:$true] %s211_s20 }
   0x7   :  { %v229_v7 = vpop.eup %228  ;;  %v133_v41 = vld [vmem:[%s432_s3 + $0x50] sm:$0xff]  ;;  %v132_v42 = vld [vmem:[%s432_s3 + $0x48] sm:$0xff]  ;;  %v131_v43 = vld [vmem:[%s432_s3 + $0x40] sm:$0xff] }
   0x8   :  { %v32_v6 = vrot.slane %v31_v5, 2  ;;  %v37_v9 = vmul.f32 8.0, %v229_v7  ;;  %vm41_vm1 = vweird.f32 %v229_v7  ;;  %144 = vmatpush.msra.mxu1 %v137_v37  ;;  %v130_v44 = vld [vmem:[%s432_s3 + $0x38] sm:$0xff]  ;;  %v129_v45 = vld [vmem:[%s432_s3 + $0x30] sm:$0xff]  ;;  %v128_v46 = vld [vmem:[%s432_s3 + $0x28] sm:$0xff] }
   0x9   :  { %v127_v47 = vld [vmem:[%s432_s3 + $0x20] sm:$0xff]  ;;  %v126_v48 = vld [vmem:[%s432_s3 + $0x18] sm:$0xff]  ;;  %v125_v49 = vld [vmem:[%s432_s3 + $0x10] sm:$0xff] }
   0xa   :  { %v33_v8 = vadd.f32 %v32_v6, %v31_v5  ;;  %v38_v11 = vsub.f32 1.0, %v37_v9  ;;  %145 = vmatpush.msra.mxu1 %v136_v38  ;;  %v225_v50 = vld [vmem:[%s431_s2] ss:$0 sm:$0xff]  ;;  %v124_v51 = vld [vmem:[%s432_s3 + $0x8] sm:$0xff]  ;;  %v179_v4 = vld [vmem:[%s434_s5 + $0x78] sm:$0xff] }
   0xb   :  { %v123_v52 = vld [vmem:[%s432_s3] sm:$0xff]  ;;  %v178_v5 = vld [vmem:[%s434_s5 + $0x70] sm:$0xff]  ;;  %184 = vmatpush.msra.mxu2 %v179_v4 }
   0xc   :  { %v34_v10 = vrot.slane %v33_v8, 1  ;;  %v39_v12 = vmul.f32 %v229_v7, %v38_v11  ;;  %146 = vmatpush.msra.mxu1 %v135_v39  ;;  %v176_v9 = vld [vmem:[%s434_s5 + $0x60] sm:$0xff]  ;;  %v175_v11 = vld [vmem:[%s434_s5 + $0x58] sm:$0xff] }
   0xd   :  { %185 = vmatpush.msra.mxu2 %v178_v5  ;;  %v227_v37 = vld [vmem:[%s435_s6] ss:$0 sm:$0xff] }
   0xe   :  { %v35_v13 = vadd.f32 %v34_v10, %v33_v8  ;;  %v40_v14 = vadd.f32 %v229_v7, %v39_v12  ;;  %147 = vmatpush.msra.mxu1 %v134_v40 }
  0x10   :  { %v313_v15 = vsel %vm41_vm1, %v229_v7, %v40_v14  ;;  %148 = vmatpush.msra.mxu1 %v133_v41  ;;  %v177_v7 = vld [vmem:[%s434_s5 + $0x68] sm:$0xff] }
  0x11   :  { %v43_v16 = vmul.f32 %v313_v15, %v35_v13  ;;  %186 = vmatpush.msra.mxu2 %v177_v7  ;;  %v174_v13 = vld [vmem:[%s434_s5 + $0x50] sm:$0xff] }
  0x12   :  { %149 = vmatpush.msra.mxu1 %v132_v42 }
  0x13   :  { %v44_v17 = vsub.f32 %v27_v1, %v43_v16  ;;  %187 = vmatpush.msra.mxu2 %v176_v9  ;;  %v173_v16 = vld [vmem:[%s434_s5 + $0x48] sm:$0xff] }
  0x14   :  { %150 = vmatpush.msra.mxu1 %v131_v43 }
  0x15   :  { %v45_v18 = vmul.f32 %v44_v17, %v44_v17  ;;  %188 = vmatpush.msra.mxu2 %v175_v11 }
  0x16   :  { %151 = vmatpush.msra.mxu1 %v130_v44 }
  0x17   :  { %v46_v19 = vsel %vm28_vm0, %v45_v18, 0.0  ;;  %189 = vmatpush.msra.mxu2 %v174_v13  ;;  %v170_v18 = vld [vmem:[%s434_s5 + $0x30] sm:$0xff] }
  0x18   :  { %v47_v20 = vrot.slane %v46_v19, 4  ;;  %152 = vmatpush.msra.mxu1 %v129_v45 }
  0x19   :  { %190 = vmatpush.msra.mxu2 %v173_v16 }
  0x1a   :  { %v48_v21 = vadd.f32 %v47_v20, %v46_v19  ;;  %153 = vmatpush.msra.mxu1 %v128_v46  ;;  %v169_v20 = vld [vmem:[%s434_s5 + $0x28] sm:$0xff] }
  0x1c   :  { %v49_v22 = vrot.slane %v48_v21, 2  ;;  %154 = vmatpush.msra.mxu1 %v127_v47 }
  0x1e   :  { %v50_v23 = vadd.f32 %v49_v22, %v48_v21  ;;  %155 = vmatpush.msra.mxu1 %v126_v48 }
  0x20   :  { %v51_v24 = vrot.slane %v50_v23, 1  ;;  %156 = vmatpush.msra.mxu1 %v125_v49 }
  0x22   :  { %v52_v25 = vadd.f32 %v51_v24, %v50_v23  ;;  %157 = vmatpush.msra.mxu1 %v124_v51 }
  0x24   :  { %v53_v26 = vmul.f32 %v52_v25, %v313_v15  ;;  %158 = vmatpush.msra.mxu1 %v123_v52 }
  0x26   :  { %v54_v27 = vadd.f32 1e-05, %v53_v26 }
  0x28   :  { %230 = vrsqrt.f32 %v54_v27  ;;  %vm61_vm2 = vweird.f32 %v54_v27 }
  0x2e   :  { %v231_v28 = vpop.eup %230 }
  0x2f   :  { %v56_v29 = vmul.f32 %v231_v28, %v54_v27  ;;  %vm62_vm3 = vweird.f32 %v231_v28 }
  0x30   :  { %vm63_vm4 = vmor %vm61_vm2, %vm62_vm3 }
  0x31   :  { %v57_v30 = vmul.f32 %v231_v28, %v56_v29  ;;  %v167_v29 = vld [vmem:[%s434_s5 + $0x18] sm:$0xff] }
  0x33   :  { %v58_v31 = vmul.f32 0.5, %v57_v30  ;;  %v166_v30 = vld [vmem:[%s434_s5 + $0x10] sm:$0xff] }
  0x35   :  { %v59_v32 = vsub.f32 1.5, %v58_v31  ;;  %v165_v31 = vld [vmem:[%s434_s5 + $0x8] sm:$0xff] }
  0x37   :  { %v60_v33 = vmul.f32 %v231_v28, %v59_v32  ;;  %v164_v32 = vld [vmem:[%s434_s5] sm:$0xff] }
  0x39   :  { %v64_v34 = vsel %vm63_vm4, %v231_v28, %v60_v33  ;;  %v168_v28 = vld [vmem:[%s434_s5 + $0x20] sm:$0xff] }
  0x3a   :  { %v65_v35 = vmul.f32 %v64_v34, %v44_v17  ;;  %v172_v17 = vld [vmem:[%s434_s5 + $0x40] sm:$0xff] }
  0x3b   :  { %191 = vmatpush.msra.mxu2 %v172_v17  ;;  %v226_v33 = vld [vmem:[%s433_s4] ss:$0 sm:$0xff] }
  0x3c   :  { %222 = vmatmul.msk.f32.vlgmr.msra.gmra.mxu0 %vm28_vm0, %v65_v35 }
  0xb9   :  { %v91_v53 = vpop.f32.mrf.mxu0 }
  0xba   :  { %v92_v54 = vadd.f32 %v225_v50, %v91_v53 }
  0xbc   :  { %232 = vtanh.f32 %v92_v54 }
  0xc2   :  { %v233_v55 = vpop.eup %232 }
  0xc3   :  { %v95_v56 = vrot.slane %v233_v55, 4 }
  0xc5   :  { %v96_v57 = vadd.f32 %v233_v55, %v95_v56 }
  0xc7   :  { %v97_v58 = vrot.slane %v96_v57, 2 }
  0xc9   :  { %v98_v59 = vadd.f32 %v97_v58, %v96_v57 }
  0xcb   :  { %v99_v60 = vrot.slane %v98_v59, 1 }
  0xcd   :  { %v100_v61 = vadd.f32 %v99_v60, %v98_v59 }
  0xcf   :  { %v101_v62 = vmul.f32 %v100_v61, %v313_v15 }
  0xd1   :  { %v102_v63 = vsub.f32 %v233_v55, %v101_v62 }
  0xd3   :  { %v103_v0 = vmul.f32 %v102_v63, %v102_v63 }
  0xd5   :  { %v104_v1 = vrot.slane %v103_v0, 4 }
  0xd7   :  { %v105_v2 = vadd.f32 %v104_v1, %v103_v0 }
  0xd9   :  { %v106_v3 = vrot.slane %v105_v2, 2 }
  0xdb   :  { %v107_v6 = vadd.f32 %v106_v3, %v105_v2 }
  0xdd   :  { %v108_v8 = vrot.slane %v107_v6, 1 }
  0xdf   :  { %v109_v10 = vadd.f32 %v108_v8, %v107_v6 }
  0xe1   :  { %v110_v12 = vmul.f32 %v109_v10, %v313_v15  ;;  %v171_v15 = vld [vmem:[%s434_s5 + $0x38] sm:$0xff]  ;;  %s213_s5 = sshll.u32 %s436_s7, 4  ;;  %s214_s5 = int_to_ptr.hbm [resolvable:$true] %s213_s5 }
  0xe2   :  { %192 = vmatpush.msra.mxu2 %v171_v15 }
  0xe3   :  { %v111_v14 = vadd.f32 1e-05, %v110_v12 }
  0xe4   :  { %193 = vmatpush.msra.mxu2 %v170_v18 }
  0xe5   :  { %234 = vrsqrt.f32 %v111_v14  ;;  %vm118_vm6 = vweird.f32 %v111_v14 }
  0xe6   :  { %194 = vmatpush.msra.mxu2 %v169_v20 }
  0xe8   :  { %195 = vmatpush.msra.mxu2 %v168_v28 }
  0xea   :  { %196 = vmatpush.msra.mxu2 %v167_v29 }
  0xeb   :  { %v235_v19 = vpop.eup %234 }
  0xec   :  { %v113_v21 = vmul.f32 %v235_v19, %v111_v14  ;;  %vm119_vm5 = vweird.f32 %v235_v19  ;;  %197 = vmatpush.msra.mxu2 %v166_v30 }
  0xed   :  { %vm120_vm7 = vmor %vm118_vm6, %vm119_vm5 }
  0xee   :  { %v114_v22 = vmul.f32 %v235_v19, %v113_v21  ;;  %198 = vmatpush.msra.mxu2 %v165_v31 }
  0xf0   :  { %v115_v23 = vmul.f32 0.5, %v114_v22  ;;  %199 = vmatpush.msra.mxu2 %v164_v32 }
  0xf2   :  { %v116_v24 = vsub.f32 1.5, %v115_v23 }
  0xf4   :  { %v117_v25 = vmul.f32 %v235_v19, %v116_v24 }
  0xf6   :  { %v121_v26 = vsel %vm120_vm7, %v235_v19, %v117_v25 }
  0xf7   :  { %v122_v27 = vmul.f32 %v121_v26, %v102_v63 }
  0xf9   :  { %159 = vmatmul.f32.vlgmr.msra.gmra.mxu1 %v122_v27 }
 0x176   :  { %v160_v34 = vpop.f32.mrf.mxu1 }
 0x177   :  { %v161_v35 = vadd.f32 %v226_v33, %v160_v34 }
 0x179   :  { %236 = vtanh.f32 %v161_v35 }
 0x17f   :  { %v237_v36 = vpop.eup %236 }
 0x180   :  { %200 = vmatmul.f32.vlgmr.msra.gmra.mxu2 %v237_v36 }
 0x203   :  { %v201_v38 = vpop.f32.mrf.mxu2 }
 0x204   :  { %v202_v39 = vadd.f32 %v227_v37, %v201_v38 }
 0x206   :  { %205 = vst.msk [vmem:[#allocation2] sm:$0xff] %vm204_vm8, %v202_v39 }
 0x207   :  { %216 = dma.vmem_to_hbm [thread:$0]  %s212_s20, 128, %s214_s5, [#allocation3]  }
 0x208   :  { %262 = dma.done.wait [#allocation3], 128  }
 0x209   :  { %263 = vsyncadd [#allocation3], 4294967168 }
 0x20a   :  { %221 = vsyncpa [#allocation3], 1 }

</bundles_post_ra>
